<compile_context>
chip_gen: v5e
topology: v5e:2x2
jax: 0.10.0
libtpu: 0.0.40
codegen_flags: <defaults>
</compile_context>

<pallas_src>
import functools

import jax
import jax.numpy as jnp
import numpy as np
from jax.experimental import pallas as pl
from jax.experimental.pallas import tpu as pltpu

_LANES = 128


def _midam_fused_kernel(params_ref, x_ref, loss_ref, *, tau):
    """Single resident block: counts + one fused weighted reduction."""
    a = params_ref[0]
    b = params_ref[1]
    alpha = params_ref[2]

    pred = x_ref[0]          # (rows, 128) f32, pads are -1.0
    vs = x_ref[1]            # (rows, 128) f32, pads are -1.0
    lab = x_ref[2]           # (rows, 128) f32, pads are -1.0

    bp = lab == 1.0
    bn = lab == 0.0
    mp = bp.astype(jnp.float32)
    mn = bn.astype(jnp.float32)

    # Class counts derived in-kernel (no wrapper reductions).  NaN loss if a
    # class is absent from the batch -- matches the reference's empty mean.
    inv_np = 1.0 / jnp.sum(mp)
    inv_nn = 1.0 / jnp.sum(mn)

    vs_safe = jnp.where(bp | bn, vs, 1.0)            # keep log/recip finite on pads
    inv_vs = pl.reciprocal(vs_safe, approx=False)    # exact: 1e-5 test tolerance
    logs = tau * jnp.log(vs_safe)                    # tau * log(s)
    g = pred * inv_vs                                # y_pred / s

    # Fused per-element expression:
    #   loss = sum_i w_i * d_i * (2*tau*g_i + d_i) + c_i * g_i
    # with w = mp/n_p + mn/n_n, d = logs - (a if pos else b),
    #      c = alpha*tau*(mn/n_n - mp/n_p).
    d = logs - jnp.where(bp, a, b)
    w = mp * inv_np + mn * inv_nn
    c = (alpha * tau) * (mn * inv_nn - mp * inv_np)

    loss_ref[0, 0] = jnp.sum(w * (d * ((2.0 * tau) * g + d)) + c * g)


def _midam_grid_kernel(params_ref, x_ref, loss_ref, acc_ref, *, tau):
    """1-D row grid: per-tile partial sums accumulated in SMEM scratch."""
    pid = pl.program_id(0)

    @pl.when(pid == 0)
    def _init():
        for k in range(6):
            acc_ref[k] = jnp.float32(0.0)

    a = params_ref[0]
    b = params_ref[1]
    alpha = params_ref[2]

    pred = x_ref[0]          # (tile_rows, 128)
    vs = x_ref[1]
    lab = x_ref[2]

    bp = lab == 1.0
    bn = lab == 0.0
    mp = bp.astype(jnp.float32)
    mn = bn.astype(jnp.float32)

    vs_safe = jnp.where(bp | bn, vs, 1.0)
    inv_vs = pl.reciprocal(vs_safe, approx=False)
    logs = tau * jnp.log(vs_safe)
    g = pred * inv_vs

    d = logs - jnp.where(bp, a, b)
    term = d * ((2.0 * tau) * g + d)     # (logs-a)^2 + 2*tau*(logs-a)*g fused

    acc_ref[0] = acc_ref[0] + jnp.sum(mp * term)   # pos: gw_p + ga numerator
    acc_ref[1] = acc_ref[1] + jnp.sum(mn * term)   # neg: gw_n + gb numerator
    acc_ref[2] = acc_ref[2] + jnp.sum(mp * g)      # pos: mean(g) numerator
    acc_ref[3] = acc_ref[3] + jnp.sum(mn * g)      # neg: mean(g) numerator
    acc_ref[4] = acc_ref[4] + jnp.sum(mp)          # n_pos
    acc_ref[5] = acc_ref[5] + jnp.sum(mn)          # n_neg

    @pl.when(pid == pl.num_programs(0) - 1)
    def _finalize():
        inv_np = 1.0 / acc_ref[4]
        inv_nn = 1.0 / acc_ref[5]
        loss = (acc_ref[0] * inv_np + acc_ref[1] * inv_nn
                + (alpha * tau) * (acc_ref[3] * inv_nn - acc_ref[2] * inv_np))
        # Lane-dense full-row store (unmasked vst); wrapper takes [0, 0].
        loss_ref[...] = jnp.full((1, _LANES), loss, dtype=jnp.float32)


@functools.partial(jax.jit, static_argnames=("tau", "gamma", "block_rows"),
                   donate_argnames=("s",))
def midam_softmax_pooling_loss(y_pred, y_true, index, s, a, b, alpha,
                               *, tau=0.1, gamma=0.9, block_rows=None):
    """Forward pass of MIDAM_softmax_pooling_loss.

    Args:
      y_pred: (N, 1) f32 smoothed-max pooling scores for the mini-batch of bags.
      y_true: (N, 1) (or (N,)) labels in {0, 1}.
      index:  (N,)   int32 bag indices into the moving-average buffer `s`.
      s:      (data_len, 1) f32 moving-average state (DONATED: updated in place).
      a, b, alpha: scalar state variables (f32).
      block_rows: optional static row-tile size (multiple of 8) forcing the
        gridded/pipelined path; None = auto (single block up to 1024 rows).
    Returns:
      (loss_scalar, new_s)
    """
    n = y_pred.shape[0]
    pred = y_pred.reshape(-1).astype(jnp.float32)
    labels = y_true.reshape(-1).astype(jnp.float32)
    idx = index.reshape(-1)

    # Moving-average update stays in the wrapper: gather + update + in-place
    # scatter (s is donated) is O(N) HBM traffic and feeds the kernel's vs.
    vs = (1.0 - gamma) * s[idx, 0].astype(jnp.float32) + gamma * pred
    new_s = s.at[idx, 0].set(vs.astype(s.dtype))

    rows = pl.cdiv(n, _LANES)
    use_grid = (block_rows is not None) or rows > 1024
    if use_grid:
        tile_rows = int(block_rows) if block_rows is not None else 512
        if tile_rows % 8 != 0:
            raise ValueError("block_rows must be a multiple of 8")
        rows_p = pl.cdiv(rows, tile_rows) * tile_rows
    else:
        tile_rows = rows_p = rows
    pad = rows_p * _LANES - n

    # One stacked, lane-dense slab: [pred, vs, labels].  Pads are labeled -1
    # so they drop out of both masks in-kernel; vs pads are fixed in-kernel.
    stacked = jnp.stack([pred, vs, labels])                       # (3, n)
    x = jnp.pad(stacked, ((0, 0), (0, pad)),
                constant_values=-1.0).reshape(3, rows_p, _LANES)

    params = jnp.stack([jnp.asarray(a, jnp.float32).reshape(()),
                        jnp.asarray(b, jnp.float32).reshape(()),
                        jnp.asarray(alpha, jnp.float32).reshape(())])

    if not use_grid:
        loss = pl.pallas_call(
            functools.partial(_midam_fused_kernel, tau=float(tau)),
            out_shape=jax.ShapeDtypeStruct((1, 1), jnp.float32),
            in_specs=[
                pl.BlockSpec(memory_space=pltpu.SMEM),               # [a,b,alpha]
                pl.BlockSpec((3, rows_p, _LANES), lambda: (0, 0, 0)),
            ],
            out_specs=pl.BlockSpec(memory_space=pltpu.SMEM),
        )(params, x)
        return loss[0, 0], new_s

    nsteps = rows_p // tile_rows
    loss = pl.pallas_call(
        functools.partial(_midam_grid_kernel, tau=float(tau)),
        out_shape=jax.ShapeDtypeStruct((1, _LANES), jnp.float32),
        grid=(nsteps,),
        in_specs=[
            pl.BlockSpec(memory_space=pltpu.SMEM),                   # [a,b,alpha]
            pl.BlockSpec((3, tile_rows, _LANES), lambda i: (0, i, 0)),
        ],
        out_specs=pl.BlockSpec((1, _LANES), lambda i: (0, 0)),       # accumulator out
        scratch_shapes=[pltpu.SMEM((8,), jnp.float32)],              # 6 partial sums
        compiler_params=pltpu.CompilerParams(
            dimension_semantics=("arbitrary",)),
    )(params, x)
    return loss[0, 0], new_s


def _reference_numpy(y_pred, y_true, index, s, a, b, alpha, tau, gamma):
    y_pred = np.asarray(y_pred).reshape(-1, 1)
    y_true = np.asarray(y_true).reshape(-1, 1)
    index = np.asarray(index).reshape(-1)
    s = np.asarray(s).copy()
    s[index] = (1 - gamma) * s[index] + gamma * y_pred
    vs = s[index]
    idx_p = (y_true == 1)
    idx_n = (y_true == 0)
    s_p, s_n = vs[idx_p], vs[idx_n]
    logs_p, logs_n = tau * np.log(s_p), tau * np.log(s_n)
    gw_ins_p = y_pred[idx_p] / s_p
    gw_ins_n = y_pred[idx_n] / s_n
    gw_p = np.mean(2 * tau * (logs_p - a) * gw_ins_p)
    gw_n = np.mean(2 * tau * (logs_n - b) * gw_ins_n)
    gw_s = alpha * tau * (np.mean(gw_ins_n) - np.mean(gw_ins_p))
    ga = np.mean((logs_p - a) ** 2)
    gb = np.mean((logs_n - b) ** 2)
    return gw_p + gw_n + gw_s + ga + gb, s


if __name__ == "__main__":
    key = jax.random.PRNGKey(0)
    tau, gamma = 0.1, 0.9         # margin only affects the optimizer, not forward()
    a0, b0, alpha0 = 0.05, -0.12, 0.3

    def run_case(data_len, batch, block_rows, case_key):
        k_pred, k_perm, k_s = jax.random.split(case_key, 3)
        # Smoothed-max pooling scores are positive in practice; squash with
        # sigmoid so log(s) stays finite.
        y_pred = jax.nn.sigmoid(jax.random.normal(k_pred, (batch, 1), jnp.float32))
        y_true = jnp.tile(jnp.array([1, 0], dtype=jnp.int32),
                          batch // 2).reshape(batch, 1)
        index = jax.random.permutation(
            k_perm, jnp.arange(data_len, dtype=jnp.int32))[:batch]
        s0 = jax.random.uniform(k_s, (data_len, 1), jnp.float32, 0.05, 0.95)

        # Host snapshots (s is donated to the jitted call, becomes invalid after).
        y_pred_np = np.asarray(y_pred)
        y_true_np = np.asarray(y_true)
        index_np = np.asarray(index)
        s_np = np.asarray(s0)

        loss, new_s = midam_softmax_pooling_loss(
            y_pred, y_true, index, jnp.asarray(s_np), a0, b0, alpha0,
            tau=tau, gamma=gamma, block_rows=block_rows)
        loss = jax.block_until_ready(loss)
        new_s = jax.block_until_ready(new_s)

        ref_loss, ref_s = _reference_numpy(
            y_pred_np, y_true_np, index_np, s_np, a0, b0, alpha0, tau, gamma)

        np.testing.assert_allclose(float(loss), float(ref_loss),
                                   rtol=1e-5, atol=1e-5)
        np.testing.assert_allclose(np.asarray(new_s), ref_s,
                                   rtol=1e-5, atol=1e-6)

    k1, k2 = jax.random.split(key)
    # Small batch: single resident block, fully fused reduction kernel.
    run_case(data_len=64, batch=16, block_rows=None, case_key=k1)
    # Larger batch: forced 1-D row grid (8-row tiles -> 2 grid steps) to
    # exercise the pipelined/accumulating path.
    run_case(data_len=4096, batch=2048, block_rows=8, case_key=k2)

    print("KERNEL_OK")
</pallas_src>

<mosaic_0001>
module attributes {stable_mosaic.version = 11 : i64} {
  func.func @_midam_fused_kernel(%arg0: memref<3xf32, #tpu.memory_space<smem>>, %arg1: memref<3x1x128xf32, #tpu.memory_space<vmem>>, %arg2: memref<1x1xf32, #tpu.memory_space<smem>>) attributes {dimension_semantics = [], scalar_prefetch = 0 : i64, scratch_operands = 0 : i64, tpu.core_type = #tpu.core_type<tc>} {
    %c0 = arith.constant 0 : index
    %0 = memref.load %arg0[%c0] : memref<3xf32, #tpu.memory_space<smem>>
    %c1 = arith.constant 1 : index
    %1 = memref.load %arg0[%c1] : memref<3xf32, #tpu.memory_space<smem>>
    %c2 = arith.constant 2 : index
    %2 = memref.load %arg0[%c2] : memref<3xf32, #tpu.memory_space<smem>>
    %c0_0 = arith.constant 0 : index
    %c0_1 = arith.constant 0 : index
    %c0_2 = arith.constant 0 : index
    %3 = vector.load %arg1[%c0_0, %c0_1, %c0_2] : memref<3x1x128xf32, #tpu.memory_space<vmem>>, vector<1x1x128xf32>
    %4 = vector.shape_cast %3 : vector<1x1x128xf32> to vector<1x128xf32>
    %c1_3 = arith.constant 1 : index
    %c0_4 = arith.constant 0 : index
    %c0_5 = arith.constant 0 : index
    %5 = vector.load %arg1[%c1_3, %c0_4, %c0_5] : memref<3x1x128xf32, #tpu.memory_space<vmem>>, vector<1x1x128xf32>
    %6 = vector.shape_cast %5 : vector<1x1x128xf32> to vector<1x128xf32>
    %c2_6 = arith.constant 2 : index
    %c0_7 = arith.constant 0 : index
    %c0_8 = arith.constant 0 : index
    %7 = vector.load %arg1[%c2_6, %c0_7, %c0_8] : memref<3x1x128xf32, #tpu.memory_space<vmem>>, vector<1x1x128xf32>
    %8 = vector.shape_cast %7 : vector<1x1x128xf32> to vector<1x128xf32>
    %cst = arith.constant 1.000000e+00 : f32
    %9 = vector.broadcast %cst : f32 to vector<1x128xf32>
    %10 = arith.cmpf oeq, %8, %9 : vector<1x128xf32>
    %cst_9 = arith.constant 0.000000e+00 : f32
    %11 = vector.broadcast %cst_9 : f32 to vector<1x128xf32>
    %12 = arith.cmpf oeq, %8, %11 : vector<1x128xf32>
    %13 = arith.extui %10 : vector<1x128xi1> to vector<1x128xi32>
    %14 = arith.sitofp %13 : vector<1x128xi32> to vector<1x128xf32>
    %15 = arith.extui %12 : vector<1x128xi1> to vector<1x128xi32>
    %16 = arith.sitofp %15 : vector<1x128xi32> to vector<1x128xf32>
    %17 = vector.shape_cast %14 : vector<1x128xf32> to vector<1x1x128xf32>
    %cst_10 = arith.constant dense<0.000000e+00> : vector<1xf32>
    %18 = vector.multi_reduction <add>, %17, %cst_10 [1, 2] : vector<1x1x128xf32> to vector<1xf32>
    %19 = vector.shape_cast %18 : vector<1xf32> to vector<1x1x1xf32>
    %20 = vector.extract %19[0, 0, 0] : f32 from vector<1x1x1xf32>
    %cst_11 = arith.constant 1.000000e+00 : f32
    %21 = arith.divf %cst_11, %20 : f32
    %22 = vector.shape_cast %16 : vector<1x128xf32> to vector<1x1x128xf32>
    %cst_12 = arith.constant dense<0.000000e+00> : vector<1xf32>
    %23 = vector.multi_reduction <add>, %22, %cst_12 [1, 2] : vector<1x1x128xf32> to vector<1xf32>
    %24 = vector.shape_cast %23 : vector<1xf32> to vector<1x1x1xf32>
    %25 = vector.extract %24[0, 0, 0] : f32 from vector<1x1x1xf32>
    %cst_13 = arith.constant 1.000000e+00 : f32
    %26 = arith.divf %cst_13, %25 : f32
    %27 = arith.ori %10, %12 : vector<1x128xi1>
    %cst_14 = arith.constant 1.000000e+00 : f32
    %28 = vector.broadcast %cst_14 : f32 to vector<1x128xf32>
    %29 = arith.select %27, %6, %28 : vector<1x128xi1>, vector<1x128xf32>
    %30 = tpu.reciprocal %29 : vector<1x128xf32> -> vector<1x128xf32>
    %31 = math.log %29 : vector<1x128xf32>
    %cst_15 = arith.constant 1.000000e-01 : f32
    %32 = vector.broadcast %cst_15 : f32 to vector<1x128xf32>
    %33 = arith.mulf %32, %31 : vector<1x128xf32>
    %34 = arith.mulf %4, %30 : vector<1x128xf32>
    %35 = vector.broadcast %0 : f32 to vector<1x128xf32>
    %36 = vector.broadcast %1 : f32 to vector<1x128xf32>
    %37 = arith.select %10, %35, %36 : vector<1x128xi1>, vector<1x128xf32>
    %38 = arith.subf %33, %37 : vector<1x128xf32>
    %39 = vector.broadcast %21 : f32 to vector<1x128xf32>
    %40 = arith.mulf %14, %39 : vector<1x128xf32>
    %41 = vector.broadcast %26 : f32 to vector<1x128xf32>
    %42 = arith.mulf %16, %41 : vector<1x128xf32>
    %43 = arith.addf %40, %42 : vector<1x128xf32>
    %cst_16 = arith.constant 1.000000e-01 : f32
    %44 = arith.mulf %2, %cst_16 : f32
    %45 = vector.broadcast %26 : f32 to vector<1x128xf32>
    %46 = arith.mulf %16, %45 : vector<1x128xf32>
    %47 = vector.broadcast %21 : f32 to vector<1x128xf32>
    %48 = arith.mulf %14, %47 : vector<1x128xf32>
    %49 = arith.subf %46, %48 : vector<1x128xf32>
    %50 = vector.broadcast %44 : f32 to vector<1x128xf32>
    %51 = arith.mulf %50, %49 : vector<1x128xf32>
    %cst_17 = arith.constant 2.000000e-01 : f32
    %52 = vector.broadcast %cst_17 : f32 to vector<1x128xf32>
    %53 = arith.mulf %52, %34 : vector<1x128xf32>
    %54 = arith.addf %53, %38 : vector<1x128xf32>
    %55 = arith.mulf %38, %54 : vector<1x128xf32>
    %56 = arith.mulf %43, %55 : vector<1x128xf32>
    %57 = arith.mulf %51, %34 : vector<1x128xf32>
    %58 = arith.addf %56, %57 : vector<1x128xf32>
    %59 = vector.shape_cast %58 : vector<1x128xf32> to vector<1x1x128xf32>
    %cst_18 = arith.constant dense<0.000000e+00> : vector<1xf32>
    %60 = vector.multi_reduction <add>, %59, %cst_18 [1, 2] : vector<1x1x128xf32> to vector<1xf32>
    %61 = vector.shape_cast %60 : vector<1xf32> to vector<1x1x1xf32>
    %62 = vector.extract %61[0, 0, 0] : f32 from vector<1x1x1xf32>
    %c0_19 = arith.constant 0 : index
    %c0_20 = arith.constant 0 : index
    %63 = memref.load %arg2[%c0_19, %c0_20] : memref<1x1xf32, #tpu.memory_space<smem>>
    memref.store %62, %arg2[%c0_19, %c0_20] : memref<1x1xf32, #tpu.memory_space<smem>>
    return
  }
}

</mosaic_0001>

<bundles_post_ra>
// kernel: midam_softmax_pooling_loss.1
= control target key start
LH: loop header
LB: loop body
LE: loop exit
PB: predicated region body
PF: predicated region fallthrough
CT: control target
= control target key end

     0   :  { %7 = vsyncpa [#allocation4], 0  ;;  %s277_s0 = inlined_call_operand.vmem [shape: f32[3], index: 0, kind: input, shape index: {}]   ;;  %s278_s1 = inlined_call_operand.vmem [shape: f32[3,1,128], index: 1, kind: input, shape index: {}]   ;;  %s279_s2 = inlined_call_operand.hbm [shape: f32[1,1], index: 2, kind: output, shape index: {}]  }
   0x1   :  { %8 = vsyncpa [#allocation3], 0  ;;  %s14_s11 = sshll.u32 %s277_s0, 4  ;;  %s214_s12 = smov [#allocation2]   ;;  %s15_s11 = int_to_ptr.vmem [resolvable:$true] %s14_s11 }
   0x2   :  { %17 = dma.vmem_to_smem %s15_s11, 16, %s214_s12, [#allocation4]  }
   0x3   :  { %210 = dma.done.wait [#allocation4], 16  }
   0x4   :  { %211 = vsyncadd [#allocation4], 4294967280 }
   0x5   :  { %24 = sfence }
   0x6   :  { %v238_v0 = vld [vmem:[%s278_s1 + $0x2] sm:$0x1]  ;;  %vm39_vm0 = vcmask 1040384   ;;  %v215_v1 = vmov 0.0   ;;  %v161_v33 = vld [vmem:[%s278_s1 + $0x1] sm:$0x1] }
   0x7   :  { %vm33_vm1 = vcmp.eq.f32.partialorder %v238_v0, 1.0  ;;  %vm34_vm2 = vcmp.eq.f32.partialorder %v238_v0, 0.0  ;;  %s25_s19 = sld [smem:[#allocation2]]  ;;  %v28_v59 = vld [vmem:[%s278_s1] sm:$0x1]  ;;  %s148_s27 = sshll.u32 %s279_s2, 4  ;;  %s149_s27 = int_to_ptr.hbm [resolvable:$true] %s148_s27 }
   0x8   :  { %v244_v2 = vsel %vm33_vm1, 1.0, %v215_v1  ;;  %vm248_vm3 = vmor %vm33_vm1, %vm34_vm2  ;;  %v254_v5 = vsel %vm34_vm2, 1.0, %v215_v1  ;;  %s159_s20 = sld [smem:[#allocation2 + $0x1]]  ;;  %s216_s29 = smov [#allocation5]  }
   0x9   :  { %v40_v4 = vsel %vm39_vm0, %v244_v2, 0.0  ;;  %v66_v6 = vsel %vm39_vm0, %v254_v5, 0.0  ;;  %v93_v35 = vsel %vm248_vm3, %v161_v33, 1.0  ;;  %s160_s23 = sld [smem:[#allocation2 + $0x2]] }
   0xa   :  { %41 = vadd.xlane.f32.xlu0 %v40_v4  ;;  %v105_v51 = vand.u32 2147483648, %v93_v35  ;;  %vm99_vm12 = vweird.f32 %v93_v35  ;;  %v103_v53 = vand.u32 2147483647, %v93_v35 }
   0xc   :  { %v106_v55 = vor.u32 1.1754944e-38, %v105_v51  ;;  %vm104_vm15 = vcmp.eq.f32.partialorder %v103_v53, 8.507059e+37 }
   0xd   :  { %v112_v49 = vstv %s25_s19 }
   0xe   :  { %v113_v50 = vstv %s159_s20 }
   0xf   :  { %v114_v58 = vsel %vm33_vm1, %v112_v49, %v113_v50  ;;  %s121_s24 = smul.f32 0.1, %s160_s23 }
  0x12   :  { %67 = vadd.xlane.f32.xlu0 %v66_v6 }
  0x7d   :  { %v42_v7 = vpop.xlane.xlu0 %41 }
  0x7e   :  { %v43_v8 = vrot.slane %v42_v7, 4 }
  0x80   :  { %v44_v9 = vadd.f32 %v43_v8, %v42_v7 }
  0x82   :  { %v45_v10 = vrot.slane %v44_v9, 2 }
  0x84   :  { %v46_v11 = vadd.f32 %v45_v10, %v44_v9  ;;  %v123_v9 = vstv %s121_s24 }
  0x85   :  { %v68_v14 = vpop.xlane.xlu0 %67 }
  0x86   :  { %v47_v12 = vrot.slane %v46_v11, 1  ;;  %v69_v15 = vrot.slane %v68_v14, 4 }
  0x88   :  { %v48_v13 = vadd.f32 %v47_v12, %v46_v11  ;;  %v70_v17 = vadd.f32 %v69_v15, %v68_v14 }
  0x8a   :  { %165 = vpush %v48_v13  ;;  %v71_v18 = vrot.slane %v70_v17, 2 }
  0x8c   :  { %v72_v21 = vadd.f32 %v71_v18, %v70_v17 }
  0x8e   :  { %v73_v26 = vrot.slane %v72_v21, 1 }
  0x90   :  { %v74_v31 = vadd.f32 %v73_v26, %v72_v21 }
  0xbb   :  { %s166_s0 = spop %165 }
  0xbc   :  { %v50_v16 = vstv %s166_s0 }
  0xbd   :  { %178 = vrcp.f32 %v50_v16  ;;  %v62_v23 = vand.u32 2147483648, %v50_v16  ;;  %v60_v25 = vand.u32 2147483647, %v50_v16  ;;  %vm56_vm5 = vweird.f32 %v50_v16 }
  0xbf   :  { %v63_v28 = vor.u32 1.1754944e-38, %v62_v23  ;;  %vm61_vm7 = vcmp.eq.f32.partialorder %v60_v25, 8.507059e+37 }
  0xc3   :  { %v179_v19 = vpop.eup %178 }
  0xc4   :  { %v52_v20 = vmul.f32 %v179_v19, %v50_v16  ;;  %vm57_vm4 = vweird.f32 %v179_v19 }
  0xc5   :  { %vm58_vm6 = vmor %vm56_vm5, %vm57_vm4 }
  0xc6   :  { %v53_v22 = vsub.f32 1.0, %v52_v20 }
  0xc8   :  { %v54_v24 = vmul.f32 %v179_v19, %v53_v22 }
  0xca   :  { %v55_v27 = vadd.f32 %v179_v19, %v54_v24 }
  0xcc   :  { %v59_v29 = vsel %vm58_vm6, %v179_v19, %v55_v27 }
  0xcd   :  { %v64_v30 = vsel %vm61_vm7, %v63_v28, %v59_v29 }
  0xce   :  { %167 = vpush %v64_v30 }
  0xcf   :  { %169 = vpush %v74_v31 }
  0xff   :  { %s258_s15 = spop %167 }
 0x100   :  { %s170_s16 = spop %169  ;;  %v116_v6 = vstv %s258_s15 }
 0x101   :  { %v76_v32 = vstv %s170_s16  ;;  %v117_v8 = vmul.f32 %v244_v2, %v116_v6 }
 0x102   :  { %180 = vrcp.f32 %v76_v32  ;;  %v88_v38 = vand.u32 2147483648, %v76_v32  ;;  %v86_v40 = vand.u32 2147483647, %v76_v32  ;;  %vm82_vm9 = vweird.f32 %v76_v32 }
 0x103   :  { %182 = vrcp.f32 %v93_v35 }
 0x104   :  { %v89_v42 = vor.u32 1.1754944e-38, %v88_v38  ;;  %vm87_vm11 = vcmp.eq.f32.partialorder %v86_v40, 8.507059e+37  ;;  %184 = vlog2.f32 %v93_v35 }
 0x108   :  { %v181_v34 = vpop.eup %180 }
 0x109   :  { %v78_v36 = vmul.f32 %v181_v34, %v76_v32  ;;  %vm83_vm8 = vweird.f32 %v181_v34  ;;  %v183_v43 = vpop.eup %182 }
 0x10a   :  { %vm84_vm10 = vmor %vm82_vm9, %vm83_vm8  ;;  %v95_v46 = vmul.f32 %v183_v43, %v93_v35  ;;  %vm100_vm13 = vweird.f32 %v183_v43  ;;  %v185_v54 = vpop.eup %184 }
 0x10b   :  { %v79_v37 = vsub.f32 1.0, %v78_v36  ;;  %vm101_vm14 = vmor %vm99_vm12, %vm100_vm13  ;;  %v109_v57 = vmul.f32 0.6931472, %v185_v54 }
 0x10c   :  { %v96_v47 = vsub.f32 1.0, %v95_v46 }
 0x10d   :  { %v80_v39 = vmul.f32 %v181_v34, %v79_v37  ;;  %v110_v61 = vmul.f32 0.1, %v109_v57 }
 0x10e   :  { %v97_v48 = vmul.f32 %v183_v43, %v96_v47 }
 0x10f   :  { %v81_v41 = vadd.f32 %v181_v34, %v80_v39  ;;  %v115_v63 = vsub.f32 %v110_v61, %v114_v58 }
 0x110   :  { %v98_v52 = vadd.f32 %v183_v43, %v97_v48 }
 0x111   :  { %v85_v44 = vsel %vm84_vm10, %v181_v34, %v81_v41 }
 0x112   :  { %v90_v45 = vsel %vm87_vm11, %v89_v42, %v85_v44  ;;  %v102_v56 = vsel %vm101_vm14, %v183_v43, %v98_v52 }
 0x113   :  { %171 = vpush %v90_v45  ;;  %v107_v60 = vsel %vm104_vm15, %v106_v55, %v102_v56 }
 0x114   :  { %v111_v62 = vmul.f32 %v107_v60, %v28_v59 }
 0x116   :  { %v125_v1 = vmul.f32 0.2, %v111_v62 }
 0x118   :  { %v126_v3 = vadd.f32 %v125_v1, %v115_v63 }
 0x11a   :  { %v127_v4 = vmul.f32 %v126_v3, %v115_v63 }
 0x144   :  { %s172_s25 = spop %171 }
 0x145   :  { %v118_v7 = vstv %s172_s25 }
 0x146   :  { %v119_v0 = vmul.f32 %v254_v5, %v118_v7 }
 0x148   :  { %v120_v10 = vadd.f32 %v119_v0, %v117_v8  ;;  %v122_v11 = vsub.f32 %v119_v0, %v117_v8 }
 0x14a   :  { %v124_v12 = vmul.f32 %v123_v9, %v122_v11  ;;  %v128_v13 = vmul.f32 %v127_v4, %v120_v10 }
 0x14c   :  { %v129_v14 = vmul.f32 %v124_v12, %v111_v62 }
 0x14e   :  { %v130_v15 = vadd.f32 %v129_v14, %v128_v13 }
 0x150   :  { %v131_v16 = vsel %vm39_vm0, %v130_v15, 0.0 }
 0x151   :  { %132 = vadd.xlane.f32.xlu1 %v131_v16 }
 0x1c4   :  { %v133_v17 = vpop.xlane.xlu1 %132 }
 0x1c5   :  { %v134_v18 = vrot.slane %v133_v17, 4 }
 0x1c7   :  { %v135_v19 = vadd.f32 %v134_v18, %v133_v17 }
 0x1c9   :  { %v136_v20 = vrot.slane %v135_v19, 2 }
 0x1cb   :  { %v137_v21 = vadd.f32 %v136_v20, %v135_v19 }
 0x1cd   :  { %v138_v22 = vrot.slane %v137_v21, 1 }
 0x1cf   :  { %v139_v23 = vadd.f32 %v138_v22, %v137_v21 }
 0x1d1   :  { %173 = vpush %v139_v23 }
 0x202   :  { %s174_s28 = spop %173 }
 0x203   :  { %142 = sst [smem:[#allocation5]] %s174_s28 }
 0x204   :  { %151 = dma.smem_to_hbm %s216_s29, 16, %s149_s27, [#allocation3]  }
 0x205   :  { %212 = dma.done.wait [#allocation3], 16  }
 0x206   :  { %213 = vsyncadd [#allocation3], 4294967280 }
 0x207   :  { %156 = sfence }
 0x208   :  { %157 = vsyncpa [#allocation3], 1 }
 0x209   :  { %158 = vsyncpa [#allocation4], 1 }

</bundles_post_ra>
